<compile_context>
chip_gen: v5e
topology: v5e:2x2
jax: 0.10.0
libtpu: 0.0.40
codegen_flags: <defaults>
</compile_context>

<pallas_src>
import functools

import jax
import jax.numpy as jnp
from jax.experimental import pallas as pl
from jax.experimental.pallas import tpu as pltpu

_ROW_PAD = 8  # pad the single last-token row to a full sublane tile


def _head_kernel(x_ref, nw_ref, w_ref, o_ref, *, eps):
    # x_ref : [_ROW_PAD, d_model]   row 0 = last-token hidden state, rest zeros
    # nw_ref: [1, d_model]          RMSNorm weight
    # w_ref : [d_model, vocab_tile] vocab slab of the (transposed) LM-head weight
    # o_ref : [_ROW_PAD, vocab_tile] logits tile (row 0 is the real one)
    #
    # The RMSNorm of one row is a handful of VALU ops; recomputing it per vocab
    # tile is negligible next to streaming the weight slab and keeps the vocab
    # grid axis safely "parallel" (megacore) with no cross-step state.
    x = x_ref[...].astype(jnp.float32)
    ms = jnp.mean(x * x, axis=-1, keepdims=True)
    xn = x * jax.lax.rsqrt(ms + eps)
    xn = xn * nw_ref[...].astype(jnp.float32)
    # Feed the MXU in the weight's (model) dtype: bf16 x bf16 -> f32 accumulate
    # is the native fast path.  Do NOT upcast the weight tile.
    xn = xn.astype(w_ref.dtype)
    o_ref[...] = jnp.dot(
        xn, w_ref[...], preferred_element_type=jnp.float32
    ).astype(o_ref.dtype)


def llama_head_logits(x, norm_weight, w_output_t, *, eps, vocab_tile=512):
    """Fused RMSNorm(x)[-1] @ w_output_t.  x: [seq, d_model]; returns f32 [vocab]."""
    assert x.ndim == 2, "expected [seq, d_model]"
    seq, d_model = x.shape
    assert w_output_t.shape[0] == d_model
    vocab = w_output_t.shape[1]
    assert vocab_tile % 128 == 0, "vocab_tile must be a multiple of 128 (lane-dense)"

    # Pad the vocab axis so the grid evenly tiles it (padded logits are sliced off).
    vocab_pad = ((vocab + vocab_tile - 1) // vocab_tile) * vocab_tile
    if vocab_pad != vocab:
        w_output_t = jnp.pad(w_output_t, ((0, 0), (0, vocab_pad - vocab)))

    # Only the last token is needed; RMSNorm is row-wise, so normalizing just
    # that row matches "normalize everything, then take x[-1]".
    x_last = jax.lax.dynamic_slice_in_dim(x, seq - 1, 1, axis=0)       # [1, d_model]
    x_pad = jnp.zeros((_ROW_PAD, d_model), x.dtype).at[0:1, :].set(x_last)

    grid = (vocab_pad // vocab_tile,)
    kernel = functools.partial(_head_kernel, eps=eps)

    logits_pad = pl.pallas_call(
        kernel,
        out_shape=jax.ShapeDtypeStruct((_ROW_PAD, vocab_pad), jnp.float32),
        grid_spec=pltpu.PrefetchScalarGridSpec(
            num_scalar_prefetch=0,
            grid=grid,
            in_specs=[
                pl.BlockSpec((_ROW_PAD, d_model), lambda j: (0, 0)),       # last token (grid-invariant, tiny)
                pl.BlockSpec((1, d_model), lambda j: (0, 0)),              # norm weight (grid-invariant, tiny)
                pl.BlockSpec((d_model, vocab_tile), lambda j: (0, j)),     # streamed LM-head weight slab
            ],
            out_specs=pl.BlockSpec((_ROW_PAD, vocab_tile), lambda j: (0, j)),
        ),
        compiler_params=pltpu.CompilerParams(
            dimension_semantics=("parallel",)),
    )(x_pad, norm_weight.reshape(1, d_model), w_output_t)

    return logits_pad[0, :vocab]


# TODO(synk): torch's descending sort / top-k / top-p truncation / multinomial
# sampling has no clean Pallas lowering (needs sort + categorical draw); it is
# implemented in plain JAX on the 1-D logits returned by the kernel.
def sample_token(logits, *, temperature, top_k, top_p, key):
    """Mirrors LlamaCausalLMHead.forward after the logits are produced."""
    if temperature == 0:
        return jnp.argmax(logits, axis=-1)
    x = logits.astype(jnp.float32) / temperature
    probs = jax.nn.softmax(x, axis=-1)
    k = min(top_k, probs.shape[-1])
    top_probs, top_idx = jax.lax.top_k(probs, k)              # sorted descending
    cum_mask = jnp.cumsum(top_probs, axis=-1) > top_p
    threshold_index = jnp.argmax(cum_mask)                    # first True (0 if none)
    keep_len = jnp.where(jnp.any(cum_mask), threshold_index + 1, k)
    keep = jnp.arange(k) < keep_len
    # torch.multinomial over the kept (renormalized) probs:
    sample_logits = jnp.where(keep, jnp.log(top_probs), -jnp.inf)
    choice = jax.random.categorical(key, sample_logits)
    return top_idx[choice]


def llama_head_logits_ref(x, norm_weight, w_output_t, *, eps):
    """Pure-JAX reference matching the PyTorch forward (norm all, take last, project)."""
    xf = x.astype(jnp.float32)
    xn = xf * jax.lax.rsqrt(jnp.mean(xf * xf, axis=-1, keepdims=True) + eps)
    xn = xn * norm_weight.astype(jnp.float32)
    return xn[-1] @ w_output_t.astype(jnp.float32)


if __name__ == "__main__":
    # Small config consistent with the module: seq=8, d_model=128, vocab=2048,
    # rms_norm_eps=1e-5, defaults temperature=0.6, top_k=50, top_p=0.9.
    seq, d_model, vocab = 8, 128, 2048
    eps = 1e-5
    temperature, top_k, top_p = 0.6, 50, 0.9
    dtype = jnp.float32

    key = jax.random.PRNGKey(0)
    kx, kw, kn, ks = jax.random.split(key, 4)

    x = jax.random.normal(kx, (seq, d_model), dtype=dtype)
    # nn.Linear weight is [vocab, d_model]; stored transposed as [d_model, vocab].
    w_output_t = (jax.random.normal(kw, (d_model, vocab), dtype=dtype)
                  * (1.0 / jnp.sqrt(d_model)))
    # LlamaNorm initializes its weight to ones; perturb slightly but keep
    # deterministic so the scale path is exercised.
    norm_weight = jnp.ones((d_model,), dtype=dtype) + 0.01 * jax.random.normal(
        kn, (d_model,), dtype=dtype)

    logits = llama_head_logits(x, norm_weight, w_output_t, eps=eps)
    logits = jax.block_until_ready(logits)

    ref_logits = llama_head_logits_ref(x, norm_weight, w_output_t, eps=eps)
    assert logits.shape == (vocab,) and logits.dtype == jnp.float32
    assert jnp.allclose(logits, ref_logits, atol=1e-4, rtol=1e-4), "logit mismatch"

    tok = sample_token(logits, temperature=temperature, top_k=top_k,
                       top_p=top_p, key=ks)
    ref_tok = sample_token(ref_logits, temperature=temperature, top_k=top_k,
                           top_p=top_p, key=ks)
    tok = int(jax.block_until_ready(tok))
    assert 0 <= tok < vocab and tok == int(ref_tok), "sampled token mismatch"

    print("KERNEL_OK")
</pallas_src>

<mosaic_0001>
module attributes {stable_mosaic.version = 11 : i64} {
  func.func @_head_kernel(%arg0: i32, %arg1: memref<8x128xf32, #tpu.memory_space<vmem>>, %arg2: memref<1x128xf32, #tpu.memory_space<vmem>>, %arg3: memref<128x512xf32, #tpu.memory_space<vmem>>, %arg4: memref<8x512xf32, #tpu.memory_space<vmem>>) attributes {dimension_semantics = [#tpu.dimension_semantics<parallel>], iteration_bounds = array<i64: 4>, scalar_prefetch = 0 : i64, scratch_operands = 0 : i64, tpu.core_type = #tpu.core_type<tc>, window_params = [{pipeline_mode = #tpu.pipeline_mode<synchronous>, transform_indices = @transform_0, window_bounds = array<i64: 8, 128>}, {pipeline_mode = #tpu.pipeline_mode<synchronous>, transform_indices = @transform_1, window_bounds = array<i64: 1, 128>}, {transform_indices = @transform_2, window_bounds = array<i64: 128, 512>}, {transform_indices = @transform_3, window_bounds = array<i64: 8, 512>}]} {
    %c0 = arith.constant 0 : index
    %c0_0 = arith.constant 0 : index
    %0 = vector.load %arg1[%c0, %c0_0] : memref<8x128xf32, #tpu.memory_space<vmem>>, vector<8x128xf32>
    %1 = arith.mulf %0, %0 : vector<8x128xf32>
    %cst = arith.constant dense<0.000000e+00> : vector<8xf32>
    %2 = vector.multi_reduction <add>, %1, %cst [1] : vector<8x128xf32> to vector<8xf32>
    %3 = vector.shape_cast %2 : vector<8xf32> to vector<8x1xf32>
    %cst_1 = arith.constant 1.280000e+02 : f32
    %4 = vector.broadcast %cst_1 : f32 to vector<8x1xf32>
    %5 = arith.divf %3, %4 : vector<8x1xf32>
    %cst_2 = arith.constant 9.99999974E-6 : f32
    %6 = vector.broadcast %cst_2 : f32 to vector<8x1xf32>
    %7 = arith.addf %5, %6 : vector<8x1xf32>
    %8 = math.rsqrt %7 : vector<8x1xf32>
    %9 = vector.broadcast %8 : vector<8x1xf32> to vector<8x128xf32>
    %10 = arith.mulf %0, %9 : vector<8x128xf32>
    %c0_3 = arith.constant 0 : index
    %c0_4 = arith.constant 0 : index
    %11 = vector.load %arg2[%c0_3, %c0_4] : memref<1x128xf32, #tpu.memory_space<vmem>>, vector<1x128xf32>
    %12 = vector.broadcast %11 : vector<1x128xf32> to vector<8x128xf32>
    %13 = arith.mulf %10, %12 : vector<8x128xf32>
    %c0_5 = arith.constant 0 : index
    %c0_6 = arith.constant 0 : index
    %14 = vector.load %arg3[%c0_5, %c0_6] : memref<128x512xf32, #tpu.memory_space<vmem>>, vector<128x512xf32>
    %cst_7 = arith.constant dense<0.000000e+00> : vector<8x512xf32>
    %15 = tpu.matmul %13, %14, %cst_7 {dimension_numbers = #tpu.dot_dimension_numbers<[1], [0], [0], [1], [0, 0, 1, 1], [], []>} : vector<8x128xf32>, vector<128x512xf32>, vector<8x512xf32> -> vector<8x512xf32>
    %c0_8 = arith.constant 0 : index
    %c0_9 = arith.constant 0 : index
    %16 = vector.load %arg4[%c0_8, %c0_9] : memref<8x512xf32, #tpu.memory_space<vmem>>, vector<8x512xf32>
    tpu.vector_store %arg4[%c0_8, %c0_9], %15 {strides = array<i32>} : memref<8x512xf32, #tpu.memory_space<vmem>>, vector<8x512xf32>,
    return
  }
  func.func @transform_0(%arg0: i32) -> (i32, i32) {
    %c0_i32 = arith.constant 0 : i32
    %c0_i32_0 = arith.constant 0 : i32
    %c0_i32_1 = arith.constant 0 : i32
    return %c0_i32, %c0_i32_0 : i32, i32
  }
  func.func @transform_1(%arg0: i32) -> (i32, i32) {
    %c0_i32 = arith.constant 0 : i32
    %c0_i32_0 = arith.constant 0 : i32
    %c0_i32_1 = arith.constant 0 : i32
    return %c0_i32, %c0_i32_0 : i32, i32
  }
  func.func @transform_2(%arg0: i32) -> (i32, i32) {
    %c0_i32 = arith.constant 0 : i32
    %c0_i32_0 = arith.constant 0 : i32
    return %c0_i32, %arg0 : i32, i32
  }
  func.func @transform_3(%arg0: i32) -> (i32, i32) {
    %c0_i32 = arith.constant 0 : i32
    %c0_i32_0 = arith.constant 0 : i32
    return %c0_i32, %arg0 : i32, i32
  }
}

</mosaic_0001>

<bundles_post_ra>
// kernel: tpu_custom_call.1
= control target key start
LH: loop header
LB: loop body
LE: loop exit
PB: predicated region body
PF: predicated region fallthrough
CT: control target
= control target key end

     0   :  { %8 = vsyncpa [#allocation3], 0  ;;  %s1018_s0 = inlined_call_operand.hbm [shape: f32[8,128], index: 0, kind: input, shape index: {}]   ;;  %s1019_s1 = inlined_call_operand.hbm [shape: f32[1,128], index: 1, kind: input, shape index: {}]   ;;  %s1020_s2 = inlined_call_operand.hbm [shape: f32[128,2048], index: 2, kind: input, shape index: {}]   ;;  %s1021_s3 = inlined_call_operand.hbm [shape: f32[8,2048], index: 3, kind: output, shape index: {}]  }
   0x1   :  { %9 = vsyncpa [#allocation6], 0 }
   0x2   :  { %10 = vsyncpa [#allocation4], 0 }
   0x3   :  { %12 = vsyncpa [#allocation4 + $0x1], 0  ;;  %s791_s12 = smov 0   ;;  %s793_s13 = smov 0  }
   0x4   :  { %s795_s14 = smov 0   ;;  %s797_s15 = smov 0  }
   0x5 LB: > { %s812_s16 = sadd.s32 4294967295, %s763_s15   ;;  %s503_s17 = sadd.s32 4294967294, %s763_s15   ;;  %s763_s15 = sphi %s797_s15, %s1031_s15   ;;  %s759_s14 = sphi %s795_s14, %s1030_s14   ;;  %s755_s13 = sphi %s793_s13, %s1029_s13   ;;  %s751_s12 = sphi %s791_s12, %s1028_s12  }
   0x6   : > { %s816_s18 = sadd.s32 1, %s763_s15   ;;  %s67_s19 = sadd.s32 1, %s759_s14 }
   0x7   : > { %s64_s20 = ssub.s32 %s763_s15, %s816_s18  ;;  %p74_p0 = scmp.ne.s32.totalorder %s759_s14, %s755_s13 }
   0x8   : > { %p65_p1 = scmp.eq.s32.totalorder %s64_s20, 0  ;;  %p75_p2 = scmp.eq.s32.totalorder %s763_s15, 0 }
   0x9   : > { %p80_p3 = scmp.ne.s32.totalorder %s755_s13, %s751_s12  ;;  %p81_p4 = scmp.eq.s32.totalorder %s812_s16, 0 }
   0xa   : > { %s828_s21 = scalar_select %p65_p1, %s759_s14, %s67_s19  }
   0xb   : > { %p830_p5 = por %p75_p2, %p74_p0  ;;  %p836_p6 = por %p81_p4, %p80_p3 }
   0xc   : > { %p104_p7 = scmp.eq.s32.totalorder %s812_s16, 3  ;;  %p110_p8 = scmp.eq.s32.totalorder %s503_s17, 3 }
   0xd   : > { %p504_p9 = scmp.ge.s32.totalorder %s763_s15, 1  ;;  %p117_p10 = scmp.lt.s32.totalorder %s763_s15, 5 }
   0xe   : > { %p843_p11 = por %p104_p7, %p74_p0  ;;  %p847_p12 = por %p110_p8, %p80_p3 }
   0xf   : > { %p851_p13 = pnand %p504_p9, %p117_p10  ;;  %s129_s29 = sshll.u32 %s1018_s0, 4  ;;  %s130_s29 = int_to_ptr.hbm [resolvable:$true] %s129_s29 }
  0x10   : > { %s765_s30 = smov [#allocation2]   ;;  %p552_p2 = scmp.lt.s32.totalorder %s763_s15, 4 }
  0x11   : > { %p535_p1 = pneg %p851_p13  ;;  %s131_s4 = sshll.u32 %s765_s30, 4  ;;  %s132_s4 = int_to_ptr.vmem [resolvable:$true] %s131_s4 }
  0x12   : > { %s141_s7 = sshll.u32 %s1019_s1, 4  ;;  %p868_p3 = pnand %p552_p2, %p830_p5  ;;  %s142_s7 = int_to_ptr.hbm [resolvable:$true] %s141_s7 }
  0x13   : > { %p536_p0 = pnand %p535_p1, %p81_p4  ;;  %s766_s9 = smov [#allocation5]  }
  0x14   : > { %s143_s10 = sshll.u32 %s766_s9, 4  ;;  %s154_s11 = sand.u32 1, %s763_s15   ;;  %s144_s10 = int_to_ptr.vmem [resolvable:$true] %s143_s10 }
  0x15   : > { %538 = dma.hbm_to_vmem [thread:$0]  (!%p536_p0), %s130_s29, 128, %s132_s4, [#allocation3]  }
  0x16   : > { %541 = dma.hbm_to_vmem [thread:$0]  (!%p536_p0), %s142_s7, 16, %s144_s10, [#allocation6]  }
  0x17   : > { %s156_s17 = sand.u32 1, %s759_s14   ;;  %s521_s20 = sshll.u32 %s763_s15, 5 }
  0x18   : > { %s508_s19 = sshll.u32 %s156_s17, 9  ;;  %s163_s30 = scalar_lea.hbm %s1020_s2, %s521_s20 }
  0x19   : > { %s164_s5 = sshll.u32 %s163_s30, 4  ;;  %s158_s29 = scalar_lea.vmem [#allocation7], %s508_s19  ;;  %s165_s5 = int_to_ptr.hbm [resolvable:$true] %s164_s5 }
  0x1a   : > { %s166_s22 = sshll.u32 %s158_s29, 4  ;;  %s155_s4 = scalar_lea.sflag [#allocation3], %s154_s11  ;;  %s167_s22 = int_to_ptr.vmem [resolvable:$true] %s166_s22 }
  0x1b   : > { %s659_s6 = sshra.s32 %s165_s5, 4  ;;  %p663_p7 = pneg %p868_p3  ;;  %s660_s6 = int_to_ptr.hbm [resolvable:$true] %s659_s6 }
  0x1c   : > { %s661_s9 = scalar_lea.hbm %s660_s6, 512  ;;  %s666_s17 = scalar_lea.hbm %s1020_s2, 2048 }
  0x1d   : > { %p662_p5 = scmp.ne.s32.totalorder %s660_s6, %s661_s9  ;;  %p667_p10 = scmp.lt.s32.totalorder %s660_s6, %s1020_s2 }
  0x1e   : > { %p668_p1 = scmp.lt.s32.totalorder %s666_s17, %s661_s9 }
  0x1f   : > { %p664_p8 = pnand %p663_p7, %p662_p5 }
  0x20   : > { %p669_p0 = por %p668_p1, %p667_p10 }
  0x21   : > { %p665_p9 = pneg %p664_p8 }
  0x23   : > { %p670_p2 = pnand %p669_p0, %p665_p9 }
  0x25   : > { %673 = shalt.err (!%p670_p2)
}
  0x26   : > { %s767_s11 = smov 2048   ;;  %s768_s19 = smov 512  }
  0x27   : > { %s769_s28 = smov 32   ;;  %178 = sbr.rel (%p851_p13) target bundleno = 333 (0x14d), region = 32 }
  0x28   : > { %545 = dma.hbm_to_vmem [thread:$0]  (!%p868_p3), %s165_s5, 8192, %s167_s22, %s155_s4, %s767_s11, %s768_s19, %s769_s28  }
  0x2c   : > { %734 = dma.done.wait (%p81_p4), [#allocation3], 128  }
  0x2d   : > { %736 = vsyncadd (%p81_p4), [#allocation3], 4294967168 }
  0x2e   : > { %738 = dma.done.wait (%p81_p4), [#allocation6], 16  }
  0x2f   : > { %740 = vsyncadd (%p81_p4), [#allocation6], 4294967280  ;;  %s190_s8 = sand.u32 1, %s812_s16   ;;  %s900_s30 = sand.u32 1, %s755_s13  }
  0x30   : > { %s514_s26 = sshll.u32 %s900_s30, 9  ;;  %s191_s5 = scalar_lea.sflag [#allocation3], %s190_s8 }
  0x31   : > { %s903_s29 = scalar_lea.vmem [#allocation7], %s514_s26 }
  0x32   : > { %742 = dma.done.wait (%p836_p6), %s191_s5, 8192  }
  0x33   : > { %744 = vsyncadd (%p836_p6), %s191_s5, 4294959104  ;;  %v909_v0 = vld [vmem:[#allocation2] sm:$0xff]  ;;  %v309_v1 = vld [vmem:[%s903_s29 + $0x1e0] sm:$0xff]  ;;  %v770_v22 = vmov 128.0   ;;  %s515_s23 = sshll.u32 %s900_s30, 5  ;;  %s522_s22 = sshll.u32 %s812_s16, 5 }
  0x34   : > { %v310_v2 = vld [vmem:[%s903_s29 + $0x1e8] sm:$0xff]  ;;  %v221_v3 = vmul.f32 %v909_v0, %v909_v0  ;;  %313 = vmatpush.msra.mxu0 %v309_v1  ;;  %v311_v4 = vld [vmem:[%s903_s29 + $0x1f0] sm:$0xff]  ;;  %v312_v5 = vld [vmem:[%s903_s29 + $0x1f8] sm:$0xff]  ;;  %595 = vrcp.f32 %v770_v22  ;;  %s217_s4 = scalar_lea.vmem [#allocation8], %s515_s23  ;;  %s409_s7 = scalar_lea.hbm %s1021_s3, %s522_s22 }
  0x35   : > { %333 = vmatpush.msra.mxu1 %v310_v2  ;;  %v305_v6 = vld [vmem:[%s903_s29 + $0x1c0] sm:$0xff]  ;;  %353 = vmatpush.msra.mxu2 %v311_v4  ;;  %v306_v7 = vld [vmem:[%s903_s29 + $0x1c8] sm:$0xff]  ;;  %v307_v8 = vld [vmem:[%s903_s29 + $0x1d0] sm:$0xff]  ;;  %s411_s10 = sshll.u32 %s217_s4, 4  ;;  %s413_s17 = sshll.u32 %s409_s7, 4  ;;  %s412_s10 = int_to_ptr.vmem [resolvable:$true] %s411_s10  ;;  %s414_s17 = int_to_ptr.hbm [resolvable:$true] %s413_s17 }
  0x36   : > { %373 = vmatpush.msra.mxu3 %v312_v5  ;;  %v308_v9 = vld [vmem:[%s903_s29 + $0x1d8] sm:$0xff]  ;;  %222 = vadd.xlane.f32.xlu0 %v221_v3  ;;  %v301_v10 = vld [vmem:[%s903_s29 + $0x1a0] sm:$0xff]  ;;  %v302_v11 = vld [vmem:[%s903_s29 + $0x1a8] sm:$0xff]  ;;  %s398_s27 = scalar_lea.sflag [#allocation4], %s900_s30  ;;  %s703_s16 = sshra.s32 %s414_s17, 4  ;;  %s704_s16 = int_to_ptr.hbm [resolvable:$true] %s703_s16 }
  0x37   : > { %314 = vmatpush.msra.mxu0 %v305_v6  ;;  %334 = vmatpush.msra.mxu1 %v306_v7  ;;  %v303_v12 = vld [vmem:[%s903_s29 + $0x1b0] sm:$0xff]  ;;  %v304_v13 = vld [vmem:[%s903_s29 + $0x1b8] sm:$0xff]  ;;  %v297_v14 = vld [vmem:[%s903_s29 + $0x180] sm:$0xff]  ;;  %s705_s20 = scalar_lea.hbm %s704_s16, 32  ;;  %s709_s28 = scalar_lea.hbm %s1021_s3, 128 }
  0x38   : > { %354 = vmatpush.msra.mxu2 %v307_v8  ;;  %374 = vmatpush.msra.mxu3 %v308_v9  ;;  %v298_v15 = vld [vmem:[%s903_s29 + $0x188] sm:$0xff]  ;;  %v299_v16 = vld [vmem:[%s903_s29 + $0x190] sm:$0xff]  ;;  %v300_v17 = vld [vmem:[%s903_s29 + $0x198] sm:$0xff]  ;;  %p706_p4 = scmp.ne.s32.totalorder %s704_s16, %s705_s20  ;;  %p710_p3 = scmp.lt.s32.totalorder %s704_s16, %s1021_s3 }
  0x39   : > { %315 = vmatpush.msra.mxu0 %v301_v10  ;;  %335 = vmatpush.msra.mxu1 %v302_v11  ;;  %v293_v18 = vld [vmem:[%s903_s29 + $0x160] sm:$0xff]  ;;  %v294_v19 = vld [vmem:[%s903_s29 + $0x168] sm:$0xff]  ;;  %v295_v20 = vld [vmem:[%s903_s29 + $0x170] sm:$0xff]  ;;  %p711_p5 = scmp.lt.s32.totalorder %s709_s28, %s705_s20 }
  0x3a   : > { %355 = vmatpush.msra.mxu2 %v303_v12  ;;  %375 = vmatpush.msra.mxu3 %v304_v13  ;;  %v296_v21 = vld [vmem:[%s903_s29 + $0x178] sm:$0xff]  ;;  %v289_v23 = vld [vmem:[%s903_s29 + $0x140] sm:$0xff]  ;;  %v290_v24 = vld [vmem:[%s903_s29 + $0x148] sm:$0xff]  ;;  %v945_v35 = vpop.eup %595  ;;  %p707_p6 = pnand %p706_p4, %p843_p11 }
  0x3b   : > { %316 = vmatpush.msra.mxu0 %v297_v14  ;;  %336 = vmatpush.msra.mxu1 %v298_v15  ;;  %v291_v25 = vld [vmem:[%s903_s29 + $0x150] sm:$0xff]  ;;  %v292_v26 = vld [vmem:[%s903_s29 + $0x158] sm:$0xff]  ;;  %v285_v27 = vld [vmem:[%s903_s29 + $0x120] sm:$0xff]  ;;  %v225_v43 = vmul.f32 128.0, %v945_v35  ;;  %vm229_vm0 = vweird.f32 %v945_v35  ;;  %p712_p7 = por %p711_p5, %p710_p3 }
  0x3c   : > { %356 = vmatpush.msra.mxu2 %v299_v16  ;;  %376 = vmatpush.msra.mxu3 %v300_v17  ;;  %v286_v28 = vld [vmem:[%s903_s29 + $0x128] sm:$0xff]  ;;  %v287_v29 = vld [vmem:[%s903_s29 + $0x130] sm:$0xff]  ;;  %v288_v30 = vld [vmem:[%s903_s29 + $0x138] sm:$0xff]  ;;  %p708_p13 = pneg %p707_p6 }
  0x3d   : > { %317 = vmatpush.msra.mxu0 %v293_v18  ;;  %337 = vmatpush.msra.mxu1 %v294_v19  ;;  %v281_v31 = vld [vmem:[%s903_s29 + $0x100] sm:$0xff]  ;;  %v282_v32 = vld [vmem:[%s903_s29 + $0x108] sm:$0xff]  ;;  %v283_v33 = vld [vmem:[%s903_s29 + $0x110] sm:$0xff]  ;;  %v226_v52 = vsub.f32 1.0, %v225_v43 }
  0x3e   : > { %357 = vmatpush.msra.mxu2 %v295_v20  ;;  %377 = vmatpush.msra.mxu3 %v296_v21  ;;  %v284_v34 = vld [vmem:[%s903_s29 + $0x118] sm:$0xff]  ;;  %v277_v36 = vld [vmem:[%s903_s29 + $0xe0] sm:$0xff]  ;;  %v278_v37 = vld [vmem:[%s903_s29 + $0xe8] sm:$0xff]  ;;  %p713_p8 = pnand %p712_p7, %p708_p13 }
  0x3f   : > { %318 = vmatpush.msra.mxu0 %v289_v23  ;;  %338 = vmatpush.msra.mxu1 %v290_v24  ;;  %v279_v38 = vld [vmem:[%s903_s29 + $0xf0] sm:$0xff]  ;;  %v280_v39 = vld [vmem:[%s903_s29 + $0xf8] sm:$0xff]  ;;  %v273_v40 = vld [vmem:[%s903_s29 + $0xc0] sm:$0xff]  ;;  %v227_v61 = vmul.f32 %v945_v35, %v226_v52 }
  0x40   : > { %358 = vmatpush.msra.mxu2 %v291_v25  ;;  %378 = vmatpush.msra.mxu3 %v292_v26  ;;  %v274_v41 = vld [vmem:[%s903_s29 + $0xc8] sm:$0xff]  ;;  %v275_v42 = vld [vmem:[%s903_s29 + $0xd0] sm:$0xff]  ;;  %v276_v44 = vld [vmem:[%s903_s29 + $0xd8] sm:$0xff] }
  0x41   : > { %319 = vmatpush.msra.mxu0 %v285_v27  ;;  %339 = vmatpush.msra.mxu1 %v286_v28  ;;  %v269_v45 = vld [vmem:[%s903_s29 + $0xa0] sm:$0xff]  ;;  %v270_v46 = vld [vmem:[%s903_s29 + $0xa8] sm:$0xff]  ;;  %v271_v47 = vld [vmem:[%s903_s29 + $0xb0] sm:$0xff]  ;;  %v228_v8 = vadd.f32 %v945_v35, %v227_v61 }
  0x42   : > { %359 = vmatpush.msra.mxu2 %v287_v29  ;;  %379 = vmatpush.msra.mxu3 %v288_v30  ;;  %v272_v48 = vld [vmem:[%s903_s29 + $0xb8] sm:$0xff]  ;;  %v265_v49 = vld [vmem:[%s903_s29 + $0x80] sm:$0xff]  ;;  %v266_v50 = vld [vmem:[%s903_s29 + $0x88] sm:$0xff] }
  0x43   : > { %320 = vmatpush.msra.mxu0 %v281_v31  ;;  %340 = vmatpush.msra.mxu1 %v282_v32  ;;  %v267_v51 = vld [vmem:[%s903_s29 + $0x90] sm:$0xff]  ;;  %v268_v53 = vld [vmem:[%s903_s29 + $0x98] sm:$0xff]  ;;  %v261_v54 = vld [vmem:[%s903_s29 + $0x60] sm:$0xff]  ;;  %v230_v9 = vsel %vm229_vm0, %v945_v35, %v228_v8 }
  0x44   : > { %360 = vmatpush.msra.mxu2 %v283_v33  ;;  %380 = vmatpush.msra.mxu3 %v284_v34  ;;  %v262_v55 = vld [vmem:[%s903_s29 + $0x68] sm:$0xff]  ;;  %v263_v56 = vld [vmem:[%s903_s29 + $0x70] sm:$0xff]  ;;  %v264_v57 = vld [vmem:[%s903_s29 + $0x78] sm:$0xff] }
  0x45   : > { %321 = vmatpush.msra.mxu0 %v277_v36  ;;  %341 = vmatpush.msra.mxu1 %v278_v37  ;;  %v257_v58 = vld [vmem:[%s903_s29 + $0x40] sm:$0xff]  ;;  %v258_v59 = vld [vmem:[%s903_s29 + $0x48] sm:$0xff]  ;;  %v259_v60 = vld [vmem:[%s903_s29 + $0x50] sm:$0xff] }
  0x46   : > { %361 = vmatpush.msra.mxu2 %v279_v38  ;;  %381 = vmatpush.msra.mxu3 %v280_v39  ;;  %v260_v62 = vld [vmem:[%s903_s29 + $0x58] sm:$0xff]  ;;  %v253_v63 = vld [vmem:[%s903_s29 + $0x20] sm:$0xff]  ;;  %v254_v1 = vld [vmem:[%s903_s29 + $0x28] sm:$0xff] }
  0x47   : > { %322 = vmatpush.msra.mxu0 %v273_v40  ;;  %342 = vmatpush.msra.mxu1 %v274_v41  ;;  %v255_v2 = vld [vmem:[%s903_s29 + $0x30] sm:$0xff]  ;;  %v256_v3 = vld [vmem:[%s903_s29 + $0x38] sm:$0xff]  ;;  %v249_v4 = vld [vmem:[%s903_s29] sm:$0xff] }
  0x48   : > { %362 = vmatpush.msra.mxu2 %v275_v42  ;;  %382 = vmatpush.msra.mxu3 %v276_v44  ;;  %v250_v5 = vld [vmem:[%s903_s29 + $0x8] sm:$0xff]  ;;  %v251_v6 = vld [vmem:[%s903_s29 + $0x10] sm:$0xff]  ;;  %v252_v7 = vld [vmem:[%s903_s29 + $0x18] sm:$0xff] }
  0x49   : > { %323 = vmatpush.msra.mxu0 %v269_v45  ;;  %343 = vmatpush.msra.mxu1 %v270_v46  ;;  %v594_v19 = vld [vmem:[#allocation5] ss:$0 sm:$0xff] }
  0x4a   : > { %363 = vmatpush.msra.mxu2 %v271_v47  ;;  %383 = vmatpush.msra.mxu3 %v272_v48 }
  0x4b   : > { %324 = vmatpush.msra.mxu0 %v265_v49  ;;  %344 = vmatpush.msra.mxu1 %v266_v50 }
  0x4c   : > { %364 = vmatpush.msra.mxu2 %v267_v51  ;;  %384 = vmatpush.msra.mxu3 %v268_v53 }
  0x4d   : > { %325 = vmatpush.msra.mxu0 %v261_v54  ;;  %345 = vmatpush.msra.mxu1 %v262_v55 }
  0x4e   : > { %365 = vmatpush.msra.mxu2 %v263_v56  ;;  %385 = vmatpush.msra.mxu3 %v264_v57 }
  0x4f   : > { %326 = vmatpush.msra.mxu0 %v257_v58  ;;  %346 = vmatpush.msra.mxu1 %v258_v59 }
  0x50   : > { %366 = vmatpush.msra.mxu2 %v259_v60  ;;  %386 = vmatpush.msra.mxu3 %v260_v62 }
  0x51   : > { %327 = vmatpush.msra.mxu0 %v253_v63  ;;  %347 = vmatpush.msra.mxu1 %v254_v1 }
  0x52   : > { %367 = vmatpush.msra.mxu2 %v255_v2  ;;  %387 = vmatpush.msra.mxu3 %v256_v3 }
  0x53   : > { %328 = vmatpush.msra.mxu0 %v249_v4  ;;  %348 = vmatpush.msra.mxu1 %v250_v5 }
  0x54   : > { %368 = vmatpush.msra.mxu2 %v251_v6  ;;  %388 = vmatpush.msra.mxu3 %v252_v7 }
  0xa9   : > { %v223_v10 = vpop.xlane.xlu0 %222 }
  0xaa   : > { %v231_v11 = vmul.f32 %v230_v9, %v223_v10 }
  0xac   : > { %v232_v12 = vadd.f32 1e-05, %v231_v11 }
  0xae   : > { %597 = vrsqrt.f32 %v232_v12  ;;  %vm239_vm2 = vweird.f32 %v232_v12 }
  0xb4   : > { %v598_v13 = vpop.eup %597 }
  0xb5   : > { %v234_v14 = vmul.f32 %v598_v13, %v232_v12  ;;  %vm240_vm1 = vweird.f32 %v598_v13 }
  0xb6   : > { %vm241_vm3 = vmor %vm239_vm2, %vm240_vm1 }
  0xb7   : > { %v235_v15 = vmul.f32 %v598_v13, %v234_v14 }
  0xb9   : > { %v236_v16 = vmul.f32 0.5, %v235_v15 }
  0xbb   : > { %v237_v17 = vsub.f32 1.5, %v236_v16 }
  0xbd   : > { %v238_v18 = vmul.f32 %v598_v13, %v237_v17 }
  0xbf   : > { %v242_v20 = vsel %vm241_vm3, %v598_v13, %v238_v18 }
  0xc0   : > { %v243_v21 = vmul.f32 %v242_v20, %v909_v0 }
  0xc2   : > { %v248_v22 = vmul.f32 %v594_v19, %v243_v21 }
  0xc4   : > { %329 = vmatmul.f32.vlgmr.msra.gmra.mxu0 %v248_v22  ;;  %349 = vmatmul.f32.vlgmr.msra.gmra.mxu1 %v248_v22 }
  0xc5   : > { %369 = vmatmul.f32.vlgmr.msra.gmra.mxu2 %v248_v22  ;;  %389 = vmatmul.f32.vlgmr.msra.gmra.mxu3 %v248_v22 }
 0x141   : > { %v330_v23 = vpop.f32.mrf.mxu0  ;;  %v350_v24 = vpop.f32.mrf.mxu1 }
 0x142   : > { %393 = vst [vmem:[%s217_s4] sm:$0xff] %v330_v23 }
 0x143   : > { %394 = vst [vmem:[%s217_s4 + $0x8] sm:$0xff] %v350_v24 }
 0x148   : > { %v370_v0 = vpop.f32.mrf.mxu2  ;;  %v390_v25 = vpop.f32.mrf.mxu3 }
 0x149   : > { %395 = vst [vmem:[%s217_s4 + $0x10] sm:$0xff] %v370_v0 }
 0x14a   : > { %396 = vst [vmem:[%s217_s4 + $0x18] sm:$0xff] %v390_v25 }
 0x14b   : > { %716 = shalt.err (!%p713_p8)
}
 0x14c   : > { %533 = dma.vmem_to_hbm [thread:$0]  (%p843_p11), %s412_s10, 512, %s414_s17, %s398_s27  }
 0x14d PF: > { %p555_p9 = scmp.ge.s32.totalorder %s763_s15, 2  ;;  %s425_s30 = sand.u32 1, %s751_s12  }
 0x14e   : > { %s426_s5 = scalar_lea.sflag [#allocation4], %s425_s30 }
 0x14f   : > { %p547_p10 = pnand %p555_p9, %p847_p12 }
 0x151   : > { %p548_p1 = pneg %p547_p10 }
 0x153   : > { %746 = dma.done.wait (%p548_p1), %s426_s5, 512  }
 0x154   : > { %748 = vsyncadd (%p548_p1), %s426_s5, 4294966784  ;;  %p15_p0 = scmp.ge.s32.totalorder %s816_s18, 6   ;;  %s1028_s12 = smov %s755_s13 }
 0x155   : > { %s1029_s13 = smov %s759_s14  ;;  %s1030_s14 = smov %s828_s21 }
 0x156   : > { %s1031_s15 = smov %s816_s18  ;;  %17 = sbr.rel (!%p15_p0) target bundleno = 5 (0x5), region = 84 }
 0x15b   :  { %432 = vsyncpa [#allocation3], 1 }
 0x15c   :  { %434 = vsyncpa [#allocation3 + $0x1], 1 }
 0x15d   :  { %435 = vsyncpa [#allocation6], 1 }
 0x15e   :  { %436 = vsyncpa [#allocation4], 1 }
 0x15f   :  { %438 = vsyncpa [#allocation4 + $0x1], 1 }

</bundles_post_ra>
